<compile_context>
chip_gen: v7x
topology: tpu7x:2x2x1
jax: 0.10.0
libtpu: 0.0.40
codegen_flags: <defaults>
</compile_context>

<pallas_src>
import functools

import numpy as np
import jax
import jax.numpy as jnp
from jax.experimental import pallas as pl
from jax.experimental.pallas import tpu as pltpu


# ------------------------------ fused kernel --------------------------------

def _fused_net_kernel(xcol_ref, pos_ref, wp_ref, out_ref, *,
                      p1sq, p2sq, k2sq, w1_rows, w1_cols, w2_rows, w2_cols,
                      nodes1, nodes2, num_labels, off):
    f32 = jnp.float32

    # ---- conv1 (+folded BN scale): ONE dot over all pool-1 sub-positions ----
    # xcol rows: (q=pool1 sub-pos | ij, a, b, n); lanes of the result: (s, c1).
    w1 = wp_ref[off["w1"]:off["w1"] + w1_rows, 0:w1_cols]
    pre1 = jnp.dot(xcol_ref[...], w1, preferred_element_type=f32)
    r1 = pre1.shape[0] // p1sq
    m1 = pre1[0:r1]
    for q in range(1, p1sq):                      # pool-1 max, aligned slices
        m1 = jnp.maximum(m1, pre1[q * r1:(q + 1) * r1])
    sh1 = wp_ref[off["sh1"]:off["sh1"] + 1, 0:w1_cols]
    a1 = jnp.maximum(m1 + sh1, 0.0)               # (k2^2*p2^2*N, hw2*C1)

    # ---- conv2: k2^2 dots on 8-aligned static row blocks, accumulated ------
    blk = a1.shape[0] // k2sq
    pre2 = None
    for ij in range(k2sq):
        w2ij = wp_ref[off["w2"] + ij * w2_rows:
                      off["w2"] + (ij + 1) * w2_rows, 0:w2_cols]
        t = jnp.dot(a1[ij * blk:(ij + 1) * blk], w2ij,
                    preferred_element_type=f32)
        pre2 = t if pre2 is None else pre2 + t    # (p2^2*N, hw2*C2)

    # ---- pool2 + BN shift + ReLU: result IS the batch-major flat features --
    nb = pre2.shape[0] // p2sq
    m2 = pre2[0:nb]
    for ab in range(1, p2sq):
        m2 = jnp.maximum(m2, pre2[ab * nb:(ab + 1) * nb])
    sh2 = wp_ref[off["sh2"]:off["sh2"] + 1, 0:w2_cols]
    flat = jnp.maximum(m2 + sh2, 0.0)             # (N, hw2*C2), rows = batch

    # ---- linear1: flatten + concat folded into two dots ---------------------
    w3a = wp_ref[off["w3a"]:off["w3a"] + w2_cols, 0:nodes1]
    w3b = wp_ref[off["w3b"]:off["w3b"] + pos_ref.shape[1], 0:nodes1]
    sh3 = wp_ref[off["sh3"]:off["sh3"] + 1, 0:nodes1]
    z = (jnp.dot(flat, w3a, preferred_element_type=f32)
         + jnp.dot(pos_ref[...], w3b, preferred_element_type=f32))
    z = jnp.maximum(z + sh3, 0.0)                 # (N, nodes1)

    # ---- linear2 + BN + ReLU, then output head ------------------------------
    w4 = wp_ref[off["w4"]:off["w4"] + nodes1, 0:nodes2]
    sh4 = wp_ref[off["sh4"]:off["sh4"] + 1, 0:nodes2]
    z = jnp.maximum(jnp.dot(z, w4, preferred_element_type=f32) + sh4, 0.0)

    w5 = wp_ref[off["w5"]:off["w5"] + nodes2, 0:num_labels]
    b5 = wp_ref[off["b5"]:off["b5"] + 1, 0:num_labels]
    out_ref[...] = jnp.dot(z, w5, preferred_element_type=f32) + b5


# ------------------------------ wrappers -------------------------------------

def _full_spec(shape):
    ndim = len(shape)
    return pl.BlockSpec(tuple(shape), lambda i: (0,) * ndim)


def make_fused_forward(cfg):
    kernel = functools.partial(
        _fused_net_kernel,
        p1sq=cfg["p1sq"], p2sq=cfg["p2sq"], k2sq=cfg["k2sq"],
        w1_rows=cfg["w1_rows"], w1_cols=cfg["w1_cols"],
        w2_rows=cfg["w2_rows"], w2_cols=cfg["w2_cols"],
        nodes1=cfg["nodes1"], nodes2=cfg["nodes2"],
        num_labels=cfg["num_labels"], off=cfg["off"])
    num_labels = cfg["num_labels"]

    def forward(karrs, x, pos):
        # Single fused XLA gather builds the duplicated, pool-grouped conv1
        # im2col (the only pre-kernel glue; no transposes, no one-hot matrix).
        xcol = jnp.take(x.reshape(-1), karrs["src"], axis=0)
        n = pos.shape[0]
        operands = (xcol, pos, karrs["wp"])
        return pl.pallas_call(
            kernel,
            out_shape=jax.ShapeDtypeStruct((n, num_labels), jnp.float32),
            grid=(1,),
            in_specs=[_full_spec(op.shape) for op in operands],
            out_specs=_full_spec((n, num_labels)),
            compiler_params=pltpu.CompilerParams(
                dimension_semantics=("arbitrary",)),
        )(*operands)

    return jax.jit(forward)


# -------------------- host-side parameter preparation ------------------------

def prepare_kernel_arrays(params, batch, num_indivs, num_sites):
    """Fold BN scales into weights, pack every constant into one buffer and
    build the constant im2col gather indices. Pure host-side, done once."""
    conv_blocks = params["conv_blocks"]
    linear_blocks = params["linear_blocks"]
    assert len(conv_blocks) == 2 and len(linear_blocks) == 2, (
        "fused kernel is specialized to 2 conv blocks + 2 hidden linears")

    w1, sc1, sh1, p1 = conv_blocks[0]
    w2, sc2, sh2, p2 = conv_blocks[1]
    c1, cin, k1, _ = w1.shape
    c2, _, k2, _ = w2.shape
    assert cin == 1, "fused kernel is specialized to Cin=1 for conv1"

    ho1, wo1 = num_indivs - k1 + 1, num_sites - k1 + 1
    hop1, wop1 = ho1 // p1, wo1 // p1
    ho2, wo2 = hop1 - k2 + 1, wop1 - k2 + 1
    hop2, wop2 = ho2 // p2, wo2 // p2
    hw2 = hop2 * wop2
    assert hop2 > 0 and wop2 > 0
    K1 = k1 * k1
    k2sq = k2 * k2
    p1sq = p1 * p1
    p2sq = p2 * p2

    w1np = np.asarray(w1, np.float32)
    sc1np = np.asarray(sc1, np.float32).reshape(c1)
    sh1np = np.asarray(sh1, np.float32).reshape(c1)
    w2np = np.asarray(w2, np.float32)
    sc2np = np.asarray(sc2, np.float32).reshape(c2)
    sh2np = np.asarray(sh2, np.float32).reshape(c2)

    # conv1 weight (features (i1,j1) x C1), BN scale folded along C1, then
    # block-diagonal over the hw2 "s" positions so lanes come out (s, c1).
    w1s = w1np[:, 0].reshape(c1, K1).T * sc1np            # (K1, C1)
    w1big = np.zeros((hw2 * K1, hw2 * c1), np.float32)
    for s in range(hw2):
        w1big[s * K1:(s + 1) * K1, s * c1:(s + 1) * c1] = w1s
    sh1big = np.tile(sh1np, hw2).reshape(1, hw2 * c1)

    # conv2: one (hw2*C1, hw2*C2) block-diagonal matrix per kernel offset.
    w2big = np.zeros((k2sq * hw2 * c1, hw2 * c2), np.float32)
    for ij in range(k2sq):
        i, j = divmod(ij, k2)
        blk = w2np[:, :, i, j].T * sc2np                   # (C1, C2), scaled
        for s in range(hw2):
            w2big[ij * hw2 * c1 + s * c1: ij * hw2 * c1 + (s + 1) * c1,
                  s * c2:(s + 1) * c2] = blk
    sh2big = np.tile(sh2np, hw2).reshape(1, hw2 * c2)

    # linear1: fold BN scale; split cat(flat, pos) weight; permute the flat
    # rows from torch order (c2, s) to the kernel's lane order (s, c2).
    wl1, sc3, sh3 = linear_blocks[0]
    wl1t = np.asarray(wl1, np.float32).T * np.asarray(sc3, np.float32).reshape(1, -1)
    initial_nodes = c2 * hw2
    nodes1 = wl1t.shape[1]
    perm = np.array([(f % c2) * hw2 + (f // c2) for f in range(initial_nodes)])
    w3a = wl1t[:initial_nodes][perm]                       # (hw2*C2, nodes1)
    w3b = wl1t[initial_nodes:]                             # (num_sites, nodes1)
    sh3np = np.asarray(sh3, np.float32).reshape(1, nodes1)

    wl2, sc4, sh4 = linear_blocks[1]
    w4 = np.asarray(wl2, np.float32).T * np.asarray(sc4, np.float32).reshape(1, -1)
    nodes2 = w4.shape[1]
    sh4np = np.asarray(sh4, np.float32).reshape(1, nodes2)

    wo, bo = params["output"]
    w5 = np.asarray(wo, np.float32).T                      # (nodes2, labels)
    b5 = np.asarray(bo, np.float32).reshape(1, -1)
    num_labels = b5.shape[1]

    # ---- pack ALL constants into one (R, width) buffer (one input DMA) ----
    def _pad8(r):
        return ((r + 7) // 8) * 8

    sections = [("w1", w1big), ("sh1", sh1big), ("w2", w2big), ("sh2", sh2big),
                ("w3a", w3a), ("w3b", w3b), ("sh3", sh3np),
                ("w4", w4), ("sh4", sh4np), ("w5", w5), ("b5", b5)]
    width = max(8, max(a.shape[1] for _, a in sections))
    off, rows = {}, 0
    for name, arr in sections:
        off[name] = rows
        rows += _pad8(arr.shape[0])
    wp = np.zeros((rows, width), np.float32)
    for name, arr in sections:
        r0 = off[name]
        wp[r0:r0 + arr.shape[0], :arr.shape[1]] = arr

    # ---- constant gather indices: duplicated, pool-grouped conv1 im2col ----
    # Rows ordered (q | ij, a, b, n); cols ordered (s, i1, j1).  Row
    # duplication bakes conv2's spatial gather into conv1's im2col so no
    # one-hot selection matrix (old sel2) is ever needed.  Scales O(batch).
    src = np.empty((p1sq, k2sq, p2, p2, batch, hw2, k1, k1), np.int64)
    for q in range(p1sq):
        alpha, beta = divmod(q, p1)
        for ij in range(k2sq):
            i, j = divmod(ij, k2)
            for a in range(p2):
                for b in range(p2):
                    for n in range(batch):
                        for s in range(hw2):
                            ph2, pw2 = divmod(s, wop2)
                            for i1 in range(k1):
                                for j1 in range(k1):
                                    H = p1 * (p2 * ph2 + a + i) + alpha + i1
                                    W = p1 * (p2 * pw2 + b + j) + beta + j1
                                    src[q, ij, a, b, n, s, i1, j1] = (
                                        (n * num_indivs + H) * num_sites + W)
    src = src.reshape(p1sq * k2sq * p2sq * batch, hw2 * K1)

    karrs = dict(wp=jnp.asarray(wp), src=jnp.asarray(src, dtype=jnp.int32))
    cfg = dict(p1sq=p1sq, p2sq=p2sq, k2sq=k2sq,
               w1_rows=hw2 * K1, w1_cols=hw2 * c1,
               w2_rows=hw2 * c1, w2_cols=hw2 * c2,
               nodes1=nodes1, nodes2=nodes2, num_labels=num_labels, off=off)
    return karrs, cfg


# ------------------------------ parameters -----------------------------------

def init_params(key, channels, kernels, pools, nodes_cfg, num_labels,
                num_indivs, num_sites):
    dims = np.array([num_indivs, num_sites], dtype=np.float64)
    for i in range(len(channels)):
        dims = dims - (kernels[i] - 1)
        dims = np.floor(dims / pools[i])
    initial_nodes = int(channels[-1] * dims[0] * dims[1])
    assert initial_nodes > 0
    nodes = [initial_nodes + num_sites] + list(nodes_cfg)
    chans = [1] + list(channels)
    eps = 1e-5

    params = {"conv_blocks": [], "linear_blocks": []}

    for i in range(len(kernels)):
        key, kw_, kg, kb, km, kv = jax.random.split(key, 6)
        cin, cout, ksz = chans[i], chans[i + 1], kernels[i]
        w = jax.random.normal(kw_, (cout, cin, ksz, ksz), jnp.float32) * 0.1
        gamma = jax.random.uniform(kg, (cout,), jnp.float32, 0.5, 1.5)
        beta = jax.random.normal(kb, (cout,), jnp.float32) * 0.1
        rmean = jax.random.normal(km, (cout,), jnp.float32) * 0.1
        rvar = jax.random.uniform(kv, (cout,), jnp.float32, 0.5, 1.5)
        scale = gamma / jnp.sqrt(rvar + eps)
        shift = beta - rmean * scale
        params["conv_blocks"].append(
            (w, scale.reshape(1, cout), shift.reshape(1, cout), pools[i]))

    for i in range(len(nodes) - 1):
        key, kw_, kg, kb, km, kv = jax.random.split(key, 6)
        din, dout = nodes[i], nodes[i + 1]
        w = jax.random.normal(kw_, (dout, din), jnp.float32) * (1.0 / np.sqrt(din))
        gamma = jax.random.uniform(kg, (dout,), jnp.float32, 0.5, 1.5)
        beta = jax.random.normal(kb, (dout,), jnp.float32) * 0.1
        rmean = jax.random.normal(km, (dout,), jnp.float32) * 0.1
        rvar = jax.random.uniform(kv, (dout,), jnp.float32, 0.5, 1.5)
        scale = gamma / jnp.sqrt(rvar + eps)
        shift = beta - rmean * scale
        params["linear_blocks"].append(
            (w, scale.reshape(1, dout), shift.reshape(1, dout)))

    key, kwo, kbo = jax.random.split(key, 3)
    wo = jax.random.normal(kwo, (num_labels, nodes[-1]), jnp.float32) * (1.0 / np.sqrt(nodes[-1]))
    bo = jax.random.normal(kbo, (num_labels,), jnp.float32) * 0.1
    params["output"] = (wo, bo)
    return params


# ------------------------------ pure-JAX reference ----------------------------

def net_forward_ref(params, x, pos):
    """Pure-JAX reference (eval-mode BN), used only for a correctness check."""
    hp = jax.lax.Precision.HIGHEST
    h = x
    for (w, scale, shift, p) in params["conv_blocks"]:
        y = jax.lax.conv_general_dilated(
            h, w, window_strides=(1, 1), padding="VALID",
            dimension_numbers=("NCHW", "OIHW", "NCHW"), precision=hp)
        c = w.shape[0]
        y = jnp.maximum(y * scale.reshape(1, c, 1, 1)
                        + shift.reshape(1, c, 1, 1), 0.0)
        N, C, H, W = y.shape
        Hp, Wp = H // p, W // p
        h = y[:, :, :Hp * p, :Wp * p].reshape(N, C, Hp, p, Wp, p).max(axis=(3, 5))
    flat = h.reshape(pos.shape[0], -1)
    z = jnp.concatenate([flat, pos], axis=1)
    for (w, scale, shift) in params["linear_blocks"]:
        z = jnp.maximum(jnp.dot(z, w.T, precision=hp) * scale + shift, 0.0)
    wo, bo = params["output"]
    return jnp.dot(z, wo.T, precision=hp) + bo


# --------------------------------- main ---------------------------------------

if __name__ == "__main__":
    # Net(num_indivs=16, num_sites=16, channels=[4,8], kernels=[3,3],
    #     pools=[2,2], nodes=[32,16], num_labels=3)
    num_indivs, num_sites = 16, 16
    channels, kernels, pools = [4, 8], [3, 3], [2, 2]
    nodes_cfg, num_labels = [32, 16], 3
    batch = 2

    key = jax.random.PRNGKey(0)
    kx, kpos, kparam = jax.random.split(key, 3)

    x = jax.random.normal(kx, (batch, 1, num_indivs, num_sites), jnp.float32)
    pos = jax.random.normal(kpos, (batch, num_sites), jnp.float32)

    params = init_params(kparam, channels, kernels, pools, nodes_cfg,
                         num_labels, num_indivs, num_sites)
    karrs, cfg = prepare_kernel_arrays(params, batch, num_indivs, num_sites)
    forward = make_fused_forward(cfg)

    out = jax.block_until_ready(forward(karrs, x, pos))
    assert out.shape == (batch, num_labels), out.shape
    assert bool(jnp.all(jnp.isfinite(out)))

    ref = jax.block_until_ready(net_forward_ref(params, x, pos))
    np.testing.assert_allclose(np.asarray(out), np.asarray(ref),
                               rtol=2e-3, atol=2e-3)
    print("KERNEL_OK")
</pallas_src>

<mosaic_0001>
module attributes {stable_mosaic.version = 11 : i64} {
  func.func @_fused_net_kernel(%arg0: i32, %arg1: memref<288x36xf32, #tpu.memory_space<vmem>>, %arg2: memref<2x16xf32, #tpu.memory_space<vmem>>, %arg3: memref<320x32xf32, #tpu.memory_space<vmem>>, %arg4: memref<2x3xf32, #tpu.memory_space<vmem>>) attributes {dimension_semantics = [#tpu.dimension_semantics<arbitrary>], iteration_bounds = array<i64: 1>, scalar_prefetch = 0 : i64, scratch_operands = 0 : i64, tpu.core_type = #tpu.core_type<tc>, window_params = [{pipeline_mode = #tpu.pipeline_mode<synchronous>, transform_indices = @transform_0, window_bounds = array<i64: 288, 36>}, {pipeline_mode = #tpu.pipeline_mode<synchronous>, transform_indices = @transform_1, window_bounds = array<i64: 2, 16>}, {pipeline_mode = #tpu.pipeline_mode<synchronous>, transform_indices = @transform_2, window_bounds = array<i64: 320, 32>}, {pipeline_mode = #tpu.pipeline_mode<synchronous>, transform_indices = @transform_3, window_bounds = array<i64: 2, 3>}]} {
    %c0 = arith.constant 0 : index
    %c0_0 = arith.constant 0 : index
    %0 = vector.load %arg3[%c0, %c0_0] : memref<320x32xf32, #tpu.memory_space<vmem>>, vector<36x16xf32>
    %c0_1 = arith.constant 0 : index
    %c0_2 = arith.constant 0 : index
    %1 = vector.load %arg1[%c0_1, %c0_2] : memref<288x36xf32, #tpu.memory_space<vmem>>, vector<288x36xf32>
    %cst = arith.constant dense<0.000000e+00> : vector<288x16xf32>
    %2 = tpu.matmul %1, %0, %cst {dimension_numbers = #tpu.dot_dimension_numbers<[1], [0], [0], [1], [0, 0, 1, 1], [], []>} : vector<288x36xf32>, vector<36x16xf32>, vector<288x16xf32> -> vector<288x16xf32>
    %3 = vector.extract_strided_slice %2 {offsets = [0, 0], sizes = [72, 16], strides = [1, 1]} : vector<288x16xf32> to vector<72x16xf32>
    %4 = vector.extract_strided_slice %2 {offsets = [72, 0], sizes = [72, 16], strides = [1, 1]} : vector<288x16xf32> to vector<72x16xf32>
    %5 = arith.maximumf %3, %4 : vector<72x16xf32>
    %6 = vector.extract_strided_slice %2 {offsets = [144, 0], sizes = [72, 16], strides = [1, 1]} : vector<288x16xf32> to vector<72x16xf32>
    %7 = arith.maximumf %5, %6 : vector<72x16xf32>
    %8 = vector.extract_strided_slice %2 {offsets = [216, 0], sizes = [72, 16], strides = [1, 1]} : vector<288x16xf32> to vector<72x16xf32>
    %9 = arith.maximumf %7, %8 : vector<72x16xf32>
    %c40 = arith.constant 40 : index
    %c0_3 = arith.constant 0 : index
    %10 = vector.load %arg3[%c40, %c0_3] : memref<320x32xf32, #tpu.memory_space<vmem>>, vector<1x16xf32>
    %11 = vector.broadcast %10 : vector<1x16xf32> to vector<72x16xf32>
    %12 = arith.addf %9, %11 : vector<72x16xf32>
    %cst_4 = arith.constant 0.000000e+00 : f32
    %13 = vector.broadcast %cst_4 : f32 to vector<72x16xf32>
    %14 = arith.maximumf %12, %13 : vector<72x16xf32>
    %c48 = arith.constant 48 : index
    %c0_5 = arith.constant 0 : index
    %15 = vector.load %arg3[%c48, %c0_5] : memref<320x32xf32, #tpu.memory_space<vmem>>, vector<16x32xf32>
    %16 = vector.extract_strided_slice %14 {offsets = [0, 0], sizes = [8, 16], strides = [1, 1]} : vector<72x16xf32> to vector<8x16xf32>
    %cst_6 = arith.constant dense<0.000000e+00> : vector<8x32xf32>
    %17 = tpu.matmul %16, %15, %cst_6 {dimension_numbers = #tpu.dot_dimension_numbers<[1], [0], [0], [1], [0, 0, 1, 1], [], []>} : vector<8x16xf32>, vector<16x32xf32>, vector<8x32xf32> -> vector<8x32xf32>
    %c64 = arith.constant 64 : index
    %c0_7 = arith.constant 0 : index
    %18 = vector.load %arg3[%c64, %c0_7] : memref<320x32xf32, #tpu.memory_space<vmem>>, vector<16x32xf32>
    %19 = vector.extract_strided_slice %14 {offsets = [8, 0], sizes = [8, 16], strides = [1, 1]} : vector<72x16xf32> to vector<8x16xf32>
    %cst_8 = arith.constant dense<0.000000e+00> : vector<8x32xf32>
    %20 = tpu.matmul %19, %18, %cst_8 {dimension_numbers = #tpu.dot_dimension_numbers<[1], [0], [0], [1], [0, 0, 1, 1], [], []>} : vector<8x16xf32>, vector<16x32xf32>, vector<8x32xf32> -> vector<8x32xf32>
    %21 = arith.addf %17, %20 : vector<8x32xf32>
    %c80 = arith.constant 80 : index
    %c0_9 = arith.constant 0 : index
    %22 = vector.load %arg3[%c80, %c0_9] : memref<320x32xf32, #tpu.memory_space<vmem>>, vector<16x32xf32>
    %23 = vector.extract_strided_slice %14 {offsets = [16, 0], sizes = [8, 16], strides = [1, 1]} : vector<72x16xf32> to vector<8x16xf32>
    %cst_10 = arith.constant dense<0.000000e+00> : vector<8x32xf32>
    %24 = tpu.matmul %23, %22, %cst_10 {dimension_numbers = #tpu.dot_dimension_numbers<[1], [0], [0], [1], [0, 0, 1, 1], [], []>} : vector<8x16xf32>, vector<16x32xf32>, vector<8x32xf32> -> vector<8x32xf32>
    %25 = arith.addf %21, %24 : vector<8x32xf32>
    %c96 = arith.constant 96 : index
    %c0_11 = arith.constant 0 : index
    %26 = vector.load %arg3[%c96, %c0_11] : memref<320x32xf32, #tpu.memory_space<vmem>>, vector<16x32xf32>
    %27 = vector.extract_strided_slice %14 {offsets = [24, 0], sizes = [8, 16], strides = [1, 1]} : vector<72x16xf32> to vector<8x16xf32>
    %cst_12 = arith.constant dense<0.000000e+00> : vector<8x32xf32>
    %28 = tpu.matmul %27, %26, %cst_12 {dimension_numbers = #tpu.dot_dimension_numbers<[1], [0], [0], [1], [0, 0, 1, 1], [], []>} : vector<8x16xf32>, vector<16x32xf32>, vector<8x32xf32> -> vector<8x32xf32>
    %29 = arith.addf %25, %28 : vector<8x32xf32>
    %c112 = arith.constant 112 : index
    %c0_13 = arith.constant 0 : index
    %30 = vector.load %arg3[%c112, %c0_13] : memref<320x32xf32, #tpu.memory_space<vmem>>, vector<16x32xf32>
    %31 = vector.extract_strided_slice %14 {offsets = [32, 0], sizes = [8, 16], strides = [1, 1]} : vector<72x16xf32> to vector<8x16xf32>
    %cst_14 = arith.constant dense<0.000000e+00> : vector<8x32xf32>
    %32 = tpu.matmul %31, %30, %cst_14 {dimension_numbers = #tpu.dot_dimension_numbers<[1], [0], [0], [1], [0, 0, 1, 1], [], []>} : vector<8x16xf32>, vector<16x32xf32>, vector<8x32xf32> -> vector<8x32xf32>
    %33 = arith.addf %29, %32 : vector<8x32xf32>
    %c128 = arith.constant 128 : index
    %c0_15 = arith.constant 0 : index
    %34 = vector.load %arg3[%c128, %c0_15] : memref<320x32xf32, #tpu.memory_space<vmem>>, vector<16x32xf32>
    %35 = vector.extract_strided_slice %14 {offsets = [40, 0], sizes = [8, 16], strides = [1, 1]} : vector<72x16xf32> to vector<8x16xf32>
    %cst_16 = arith.constant dense<0.000000e+00> : vector<8x32xf32>
    %36 = tpu.matmul %35, %34, %cst_16 {dimension_numbers = #tpu.dot_dimension_numbers<[1], [0], [0], [1], [0, 0, 1, 1], [], []>} : vector<8x16xf32>, vector<16x32xf32>, vector<8x32xf32> -> vector<8x32xf32>
    %37 = arith.addf %33, %36 : vector<8x32xf32>
    %c144 = arith.constant 144 : index
    %c0_17 = arith.constant 0 : index
    %38 = vector.load %arg3[%c144, %c0_17] : memref<320x32xf32, #tpu.memory_space<vmem>>, vector<16x32xf32>
    %39 = vector.extract_strided_slice %14 {offsets = [48, 0], sizes = [8, 16], strides = [1, 1]} : vector<72x16xf32> to vector<8x16xf32>
    %cst_18 = arith.constant dense<0.000000e+00> : vector<8x32xf32>
    %40 = tpu.matmul %39, %38, %cst_18 {dimension_numbers = #tpu.dot_dimension_numbers<[1], [0], [0], [1], [0, 0, 1, 1], [], []>} : vector<8x16xf32>, vector<16x32xf32>, vector<8x32xf32> -> vector<8x32xf32>
    %41 = arith.addf %37, %40 : vector<8x32xf32>
    %c160 = arith.constant 160 : index
    %c0_19 = arith.constant 0 : index
    %42 = vector.load %arg3[%c160, %c0_19] : memref<320x32xf32, #tpu.memory_space<vmem>>, vector<16x32xf32>
    %43 = vector.extract_strided_slice %14 {offsets = [56, 0], sizes = [8, 16], strides = [1, 1]} : vector<72x16xf32> to vector<8x16xf32>
    %cst_20 = arith.constant dense<0.000000e+00> : vector<8x32xf32>
    %44 = tpu.matmul %43, %42, %cst_20 {dimension_numbers = #tpu.dot_dimension_numbers<[1], [0], [0], [1], [0, 0, 1, 1], [], []>} : vector<8x16xf32>, vector<16x32xf32>, vector<8x32xf32> -> vector<8x32xf32>
    %45 = arith.addf %41, %44 : vector<8x32xf32>
    %c176 = arith.constant 176 : index
    %c0_21 = arith.constant 0 : index
    %46 = vector.load %arg3[%c176, %c0_21] : memref<320x32xf32, #tpu.memory_space<vmem>>, vector<16x32xf32>
    %47 = vector.extract_strided_slice %14 {offsets = [64, 0], sizes = [8, 16], strides = [1, 1]} : vector<72x16xf32> to vector<8x16xf32>
    %cst_22 = arith.constant dense<0.000000e+00> : vector<8x32xf32>
    %48 = tpu.matmul %47, %46, %cst_22 {dimension_numbers = #tpu.dot_dimension_numbers<[1], [0], [0], [1], [0, 0, 1, 1], [], []>} : vector<8x16xf32>, vector<16x32xf32>, vector<8x32xf32> -> vector<8x32xf32>
    %49 = arith.addf %45, %48 : vector<8x32xf32>
    %50 = vector.extract_strided_slice %49 {offsets = [0, 0], sizes = [2, 32], strides = [1, 1]} : vector<8x32xf32> to vector<2x32xf32>
    %51 = vector.extract_strided_slice %49 {offsets = [2, 0], sizes = [2, 32], strides = [1, 1]} : vector<8x32xf32> to vector<2x32xf32>
    %52 = arith.maximumf %50, %51 : vector<2x32xf32>
    %53 = vector.extract_strided_slice %49 {offsets = [4, 0], sizes = [2, 32], strides = [1, 1]} : vector<8x32xf32> to vector<2x32xf32>
    %54 = arith.maximumf %52, %53 : vector<2x32xf32>
    %55 = vector.extract_strided_slice %49 {offsets = [6, 0], sizes = [2, 32], strides = [1, 1]} : vector<8x32xf32> to vector<2x32xf32>
    %56 = arith.maximumf %54, %55 : vector<2x32xf32>
    %c192 = arith.constant 192 : index
    %c0_23 = arith.constant 0 : index
    %57 = vector.load %arg3[%c192, %c0_23] : memref<320x32xf32, #tpu.memory_space<vmem>>, vector<1x32xf32>
    %58 = vector.broadcast %57 : vector<1x32xf32> to vector<2x32xf32>
    %59 = arith.addf %56, %58 : vector<2x32xf32>
    %cst_24 = arith.constant 0.000000e+00 : f32
    %60 = vector.broadcast %cst_24 : f32 to vector<2x32xf32>
    %61 = arith.maximumf %59, %60 : vector<2x32xf32>
    %c200 = arith.constant 200 : index
    %c0_25 = arith.constant 0 : index
    %62 = vector.load %arg3[%c200, %c0_25] : memref<320x32xf32, #tpu.memory_space<vmem>>, vector<32x32xf32>
    %c232 = arith.constant 232 : index
    %c0_26 = arith.constant 0 : index
    %63 = vector.load %arg3[%c232, %c0_26] : memref<320x32xf32, #tpu.memory_space<vmem>>, vector<16x32xf32>
    %c248 = arith.constant 248 : index
    %c0_27 = arith.constant 0 : index
    %64 = vector.load %arg3[%c248, %c0_27] : memref<320x32xf32, #tpu.memory_space<vmem>>, vector<1x32xf32>
    %cst_28 = arith.constant dense<0.000000e+00> : vector<2x32xf32>
    %65 = tpu.matmul %61, %62, %cst_28 {dimension_numbers = #tpu.dot_dimension_numbers<[1], [0], [0], [1], [0, 0, 1, 1], [], []>} : vector<2x32xf32>, vector<32x32xf32>, vector<2x32xf32> -> vector<2x32xf32>
    %c0_29 = arith.constant 0 : index
    %c0_30 = arith.constant 0 : index
    %66 = vector.load %arg2[%c0_29, %c0_30] : memref<2x16xf32, #tpu.memory_space<vmem>>, vector<2x16xf32>
    %cst_31 = arith.constant dense<0.000000e+00> : vector<2x32xf32>
    %67 = tpu.matmul %66, %63, %cst_31 {dimension_numbers = #tpu.dot_dimension_numbers<[1], [0], [0], [1], [0, 0, 1, 1], [], []>} : vector<2x16xf32>, vector<16x32xf32>, vector<2x32xf32> -> vector<2x32xf32>
    %68 = arith.addf %65, %67 : vector<2x32xf32>
    %69 = vector.broadcast %64 : vector<1x32xf32> to vector<2x32xf32>
    %70 = arith.addf %68, %69 : vector<2x32xf32>
    %cst_32 = arith.constant 0.000000e+00 : f32
    %71 = vector.broadcast %cst_32 : f32 to vector<2x32xf32>
    %72 = arith.maximumf %70, %71 : vector<2x32xf32>
    %c256 = arith.constant 256 : index
    %c0_33 = arith.constant 0 : index
    %73 = vector.load %arg3[%c256, %c0_33] : memref<320x32xf32, #tpu.memory_space<vmem>>, vector<32x16xf32>
    %c288 = arith.constant 288 : index
    %c0_34 = arith.constant 0 : index
    %74 = vector.load %arg3[%c288, %c0_34] : memref<320x32xf32, #tpu.memory_space<vmem>>, vector<1x16xf32>
    %cst_35 = arith.constant dense<0.000000e+00> : vector<2x16xf32>
    %75 = tpu.matmul %72, %73, %cst_35 {dimension_numbers = #tpu.dot_dimension_numbers<[1], [0], [0], [1], [0, 0, 1, 1], [], []>} : vector<2x32xf32>, vector<32x16xf32>, vector<2x16xf32> -> vector<2x16xf32>
    %76 = vector.broadcast %74 : vector<1x16xf32> to vector<2x16xf32>
    %77 = arith.addf %75, %76 : vector<2x16xf32>
    %cst_36 = arith.constant 0.000000e+00 : f32
    %78 = vector.broadcast %cst_36 : f32 to vector<2x16xf32>
    %79 = arith.maximumf %77, %78 : vector<2x16xf32>
    %c296 = arith.constant 296 : index
    %c0_37 = arith.constant 0 : index
    %80 = vector.load %arg3[%c296, %c0_37] : memref<320x32xf32, #tpu.memory_space<vmem>>, vector<16x3xf32>
    %c312 = arith.constant 312 : index
    %c0_38 = arith.constant 0 : index
    %81 = vector.load %arg3[%c312, %c0_38] : memref<320x32xf32, #tpu.memory_space<vmem>>, vector<1x3xf32>
    %cst_39 = arith.constant dense<0.000000e+00> : vector<2x3xf32>
    %82 = tpu.matmul %79, %80, %cst_39 {dimension_numbers = #tpu.dot_dimension_numbers<[1], [0], [0], [1], [0, 0, 1, 1], [], []>} : vector<2x16xf32>, vector<16x3xf32>, vector<2x3xf32> -> vector<2x3xf32>
    %83 = vector.broadcast %81 : vector<1x3xf32> to vector<2x3xf32>
    %84 = arith.addf %82, %83 : vector<2x3xf32>
    %c0_40 = arith.constant 0 : index
    %c0_41 = arith.constant 0 : index
    %85 = vector.load %arg4[%c0_40, %c0_41] : memref<2x3xf32, #tpu.memory_space<vmem>>, vector<2x3xf32>
    tpu.vector_store %arg4[%c0_40, %c0_41], %84 {strides = array<i32>} : memref<2x3xf32, #tpu.memory_space<vmem>>, vector<2x3xf32>,
    return
  }
  func.func @transform_0(%arg0: i32) -> (i32, i32) {
    %c0_i32 = arith.constant 0 : i32
    %c0_i32_0 = arith.constant 0 : i32
    %c0_i32_1 = arith.constant 0 : i32
    return %c0_i32, %c0_i32_0 : i32, i32
  }
  func.func @transform_1(%arg0: i32) -> (i32, i32) {
    %c0_i32 = arith.constant 0 : i32
    %c0_i32_0 = arith.constant 0 : i32
    %c0_i32_1 = arith.constant 0 : i32
    return %c0_i32, %c0_i32_0 : i32, i32
  }
  func.func @transform_2(%arg0: i32) -> (i32, i32) {
    %c0_i32 = arith.constant 0 : i32
    %c0_i32_0 = arith.constant 0 : i32
    %c0_i32_1 = arith.constant 0 : i32
    return %c0_i32, %c0_i32_0 : i32, i32
  }
  func.func @transform_3(%arg0: i32) -> (i32, i32) {
    %c0_i32 = arith.constant 0 : i32
    %c0_i32_0 = arith.constant 0 : i32
    %c0_i32_1 = arith.constant 0 : i32
    return %c0_i32, %c0_i32_0 : i32, i32
  }
}

</mosaic_0001>

<bundles_post_ra>
// kernel: forward.1
= control target key start
LH: loop header
LB: loop body
LE: loop exit
PB: predicated region body
PF: predicated region fallthrough
CT: control target
= control target key end

     0   :  { %vm56_vm0 = vcmask 293888   ;;  %vm165_vm1 = vcmask 1043456   ;;  %s2295_s0 = inlined_call_operand.vmem [shape: f32[288,36], index: 0, kind: input, shape index: {}]   ;;  %s2296_s1 = inlined_call_operand.vmem [shape: f32[2,16], index: 1, kind: input, shape index: {}]   ;;  %s2297_s2 = inlined_call_operand.vmem [shape: f32[320,32], index: 2, kind: input, shape index: {}]   ;;  %s2298_s3 = inlined_call_operand.hbm [shape: f32[2,3], index: 3, kind: output, shape index: {}]  }
   0x1   :  { %v15_v0 = vld [vmem:[%s2297_s2] sm:$0xff]  ;;  %v16_v1 = vld [vmem:[%s2297_s2 + $0x8] sm:$0xff]  ;;  %v17_v2 = vld [vmem:[%s2297_s2 + $0x10] sm:$0xff] }
   0x2   :  { %v1806_v3 = vpack.c.bf16 %v16_v1, %v15_v0  ;;  %v18_v4 = vld [vmem:[%s2297_s2 + $0x18] sm:$0xff]  ;;  %v20_v5 = vld [vmem:[%s2295_s0] sm:$0xff]  ;;  %v21_v8 = vld [vmem:[%s2295_s0 + $0x8] sm:$0xff] }
   0x3   :  { %v1810_v6 = vpack.c.bf16 %v18_v4, %v17_v2  ;;  %1653 = vmatprep.mubr.msk.f32.mxu0 %vm56_vm0, %v20_v5  ;;  %v19_v7 = vld [vmem:[%s2297_s2 + $0x20] sm:$0xf]  ;;  %v54_v9 = vld [vmem:[%s2295_s0 + $0x110] sm:$0xff]  ;;  %v55_v10 = vld [vmem:[%s2295_s0 + $0x118] sm:$0xff] }
   0x4   :  { %1807 = vmatprep.subr.bf16.mxu0 %v1806_v3  ;;  %1859 = vmatprep.subr.bf16.mxu1 %v1806_v3  ;;  %v22_v11 = vld [vmem:[%s2295_s0 + $0x10] sm:$0xff] }
   0x5   :  { %1809 = vmatpush3.bf16.msra.mxu0 %v1806_v3  ;;  %1862 = vmatpush3.bf16.msra.mxu1 %v1806_v3 }
   0x6   :  { %1811 = vmatprep.subr.bf16.mxu0 %v1810_v6  ;;  %1860 = vmatprep.subr.bf16.mxu1 %v1810_v6 }
   0x7   :  { %1704 = vmatprep.mubr.msk.f32.mxu1 %vm56_vm0, %v54_v9 }
   0x9   :  { %1813 = vmatpush3.bf16.msra.mxu0 %v1810_v6  ;;  %1863 = vmatpush3.bf16.msra.mxu1 %v1810_v6 }
   0xa   :  { %1651 = vmatprep.subr.msk.mxu0 %vm165_vm1, %v19_v7  ;;  %1861 = vmatprep.subr.msk.mxu1 %vm165_vm1, %v19_v7 }
   0xd   :  { %1652 = vmatpush3.msk.msra.mxu0 %vm165_vm1, %v19_v7  ;;  %1864 = vmatpush3.msk.msra.mxu1 %vm165_vm1, %v19_v7 }
   0xe   :  { %1654 = vmatmul.mubr.msk.f32.vlgmr.msra.gmra.mrb[0].mxu0 %vm56_vm0, %v21_v8  ;;  %1705 = vmatmul.mubr.msk.f32.vlgmr.msra.gmra.mrb[0].mxu1 %vm56_vm0, %v55_v10 }
   0xf   :  { %8 = vsyncpa [#allocation3], 0  ;;  %1656 = vmatprep.mubr.msk.f32.mxu0 %vm56_vm0, %v22_v11  ;;  %v23_v12 = vld [vmem:[%s2295_s0 + $0x18] sm:$0xff]  ;;  %v24_v13 = vld [vmem:[%s2295_s0 + $0x20] sm:$0xff]  ;;  %v1909_v46 = vmov 0.0|0.0   ;;  %vm1910_vm2 = vmmov 0  }
  0x10   :  { %v25_v14 = vld [vmem:[%s2295_s0 + $0x28] sm:$0xff]  ;;  %v26_v15 = vld [vmem:[%s2295_s0 + $0x30] sm:$0xff]  ;;  %v27_v16 = vld [vmem:[%s2295_s0 + $0x38] sm:$0xff]  ;;  %1814 = vmatprep.subr.bf16.mxu1 %v1909_v46  ;;  %v1911_v47 = vmov 0.0   ;;  %vm468_vm3 = vcmask 130048   ;;  %vm1245_vm4 = vcmask 261120  }
  0x11   :  { %v28_v17 = vld [vmem:[%s2295_s0 + $0x40] sm:$0xff]  ;;  %v29_v18 = vld [vmem:[%s2295_s0 + $0x48] sm:$0xff]  ;;  %v30_v19 = vld [vmem:[%s2295_s0 + $0x50] sm:$0xff]  ;;  %1711 = vmatprep.mubr.msk.f32.mxu1 %vm1910_vm2, %v1911_v47  ;;  %s1912_s27 = smov [#allocation2]   ;;  %vm1488_vm5 = vcmask 17408  }
  0x12   :  { %1657 = vmatmul.mubr.msk.f32.gmra.mrb[2].mxu0 %vm56_vm0, %v23_v12  ;;  %v31_v20 = vld [vmem:[%s2295_s0 + $0x58] sm:$0xff]  ;;  %v32_v21 = vld [vmem:[%s2295_s0 + $0x60] sm:$0xff]  ;;  %v33_v22 = vld [vmem:[%s2295_s0 + $0x68] sm:$0xff]  ;;  %s1496_s28 = sshll.u32 %s1912_s27, 4  ;;  %s1497_s28 = int_to_ptr.vmem [resolvable:$true] %s1496_s28 }
  0x13   :  { %1659 = vmatprep.mubr.msk.f32.mxu0 %vm56_vm0, %v24_v13  ;;  %v34_v23 = vld [vmem:[%s2295_s0 + $0x70] sm:$0xff]  ;;  %v35_v24 = vld [vmem:[%s2295_s0 + $0x78] sm:$0xff]  ;;  %v36_v25 = vld [vmem:[%s2295_s0 + $0x80] sm:$0xff]  ;;  %s1885_s29 = scalar_lea.vmem %s1497_s28, 32  ;;  %p1890_p1 = scmp.lt.s32.totalorder %s1497_s28, %s1497_s28 }
  0x14   :  { %v37_v26 = vld [vmem:[%s2295_s0 + $0x88] sm:$0xff]  ;;  %v38_v27 = vld [vmem:[%s2295_s0 + $0x90] sm:$0xff]  ;;  %v39_v28 = vld [vmem:[%s2295_s0 + $0x98] sm:$0xff]  ;;  %p1886_p0 = scmp.ne.s32.totalorder %s1497_s28, %s1885_s29  ;;  %p1891_p2 = scmp.lt.s32.totalorder %s1885_s29, %s1885_s29 }
  0x15   :  { %v40_v29 = vld [vmem:[%s2295_s0 + $0xa0] sm:$0xff]  ;;  %v41_v30 = vld [vmem:[%s2295_s0 + $0xa8] sm:$0xff]  ;;  %v42_v31 = vld [vmem:[%s2295_s0 + $0xb0] sm:$0xff] }
  0x16   :  { %1660 = vmatmul.mubr.msk.f32.gmra.mrb[4].mxu0 %vm56_vm0, %v25_v14  ;;  %v43_v32 = vld [vmem:[%s2295_s0 + $0xb8] sm:$0xff]  ;;  %v44_v33 = vld [vmem:[%s2295_s0 + $0xc0] sm:$0xff]  ;;  %v45_v34 = vld [vmem:[%s2295_s0 + $0xc8] sm:$0xff]  ;;  %p1892_p3 = por %p1891_p2, %p1890_p1 }
  0x17   :  { %1662 = vmatprep.mubr.msk.f32.mxu0 %vm56_vm0, %v26_v15  ;;  %v46_v35 = vld [vmem:[%s2295_s0 + $0xd0] sm:$0xff]  ;;  %v47_v36 = vld [vmem:[%s2295_s0 + $0xd8] sm:$0xff]  ;;  %v48_v37 = vld [vmem:[%s2295_s0 + $0xe0] sm:$0xff] }
  0x18   :  { %v49_v38 = vld [vmem:[%s2295_s0 + $0xe8] sm:$0xff]  ;;  %v50_v39 = vld [vmem:[%s2295_s0 + $0xf0] sm:$0xff]  ;;  %v51_v40 = vld [vmem:[%s2295_s0 + $0xf8] sm:$0xff]  ;;  %p1893_p4 = pnand %p1892_p3, %p1886_p0 }
  0x19   :  { %v52_v41 = vld [vmem:[%s2295_s0 + $0x100] sm:$0xff]  ;;  %v53_v42 = vld [vmem:[%s2295_s0 + $0x108] sm:$0xff] }
  0x1a   :  { %1663 = vmatmul.mubr.msk.f32.gmra.mrb[6].mxu0 %vm56_vm0, %v27_v16  ;;  %v466_v43 = vld [vmem:[%s2297_s2 + $0x40] sm:$0xff]  ;;  %v467_v44 = vld [vmem:[%s2297_s2 + $0x48] sm:$0xff] }
  0x1b   :  { %1665 = vmatprep.mubr.msk.f32.mxu0 %vm56_vm0, %v28_v17  ;;  %v1815_v45 = vpack.c.bf16 %v467_v44, %v466_v43 }
  0x1d   :  { %1816 = vmatpush3.bf16.msra.mxu1 %v1815_v45 }
  0x1e   :  { %1666 = vmatmul.mubr.msk.f32.gmra.mrb[8].mxu0 %vm56_vm0, %v29_v18  ;;  %1817 = vmatprep.subr.bf16.mxu1 %v1909_v46 }
  0x1f   :  { %1668 = vmatprep.mubr.msk.f32.mxu0 %vm56_vm0, %v30_v19 }
  0x22   :  { %1669 = vmatmul.mubr.msk.f32.gmra.mrb[10].mxu0 %vm56_vm0, %v31_v20 }
  0x23   :  { %1671 = vmatprep.mubr.msk.f32.mxu0 %vm56_vm0, %v32_v21 }
  0x26   :  { %1672 = vmatmul.mubr.msk.f32.gmra.mrb[12].mxu0 %vm56_vm0, %v33_v22 }
  0x27   :  { %1674 = vmatprep.mubr.msk.f32.mxu0 %vm56_vm0, %v34_v23 }
  0x2a   :  { %1675 = vmatmul.mubr.msk.f32.gmra.mrb[14].mxu0 %vm56_vm0, %v35_v24 }
  0x2b   :  { %1677 = vmatprep.mubr.msk.f32.mxu0 %vm56_vm0, %v36_v25 }
  0x2e   :  { %1678 = vmatmul.mubr.msk.f32.gmra.mrb[16].mxu0 %vm56_vm0, %v37_v26 }
  0x2f   :  { %1680 = vmatprep.mubr.msk.f32.mxu0 %vm56_vm0, %v38_v27 }
  0x32   :  { %1681 = vmatmul.mubr.msk.f32.gmra.mrb[18].mxu0 %vm56_vm0, %v39_v28 }
  0x33   :  { %1683 = vmatprep.mubr.msk.f32.mxu0 %vm56_vm0, %v40_v29 }
  0x36   :  { %1684 = vmatmul.mubr.msk.f32.gmra.mrb[20].mxu0 %vm56_vm0, %v41_v30 }
  0x37   :  { %1686 = vmatprep.mubr.msk.f32.mxu0 %vm56_vm0, %v42_v31 }
  0x3a   :  { %1687 = vmatmul.mubr.msk.f32.gmra.mrb[22].mxu0 %vm56_vm0, %v43_v32 }
  0x3b   :  { %1689 = vmatprep.mubr.msk.f32.mxu0 %vm56_vm0, %v44_v33 }
  0x3e   :  { %1690 = vmatmul.mubr.msk.f32.gmra.mrb[24].mxu0 %vm56_vm0, %v45_v34 }
  0x3f   :  { %1692 = vmatprep.mubr.msk.f32.mxu0 %vm56_vm0, %v46_v35 }
  0x42   :  { %1693 = vmatmul.mubr.msk.f32.gmra.mrb[26].mxu0 %vm56_vm0, %v47_v36  ;;  %v2115_v36 = vld [vmem:[%s2297_s2 + $0x28] ss:$0 sm:$0xff] }
  0x43   :  { %1695 = vmatprep.mubr.msk.f32.mxu0 %vm56_vm0, %v48_v37 }
  0x46   :  { %1696 = vmatmul.mubr.msk.f32.gmra.mrb[28].mxu0 %vm56_vm0, %v49_v38 }
  0x47   :  { %1698 = vmatprep.mubr.msk.f32.mxu0 %vm56_vm0, %v50_v39 }
  0x4a   :  { %1699 = vmatmul.mubr.msk.f32.gmra.mrb[30].mxu0 %vm56_vm0, %v51_v40 }
  0x4b   :  { %1701 = vmatprep.mubr.msk.f32.mxu0 %vm56_vm0, %v52_v41  ;;  %v464_v41 = vld [vmem:[%s2297_s2 + $0x30] sm:$0xff] }
  0x4e   :  { %1702 = vmatmul.mubr.msk.f32.gmra.mrb[32].mxu0 %vm56_vm0, %v53_v42  ;;  %v465_v42 = vld [vmem:[%s2297_s2 + $0x38] sm:$0xff] }
  0xe1   :  { %v1655_v48 = vpop.f32.mrb[0].mxu0  ;;  %v1706_v49 = vpop.f32.mrb[0].mxu1 }
  0xe2   :  { %v235_v50 = vpop.f32.mrb[1].mxu0  ;;  %v2102_v51 = vpop.f32.mrb[1].mxu1 }
  0xe5   :  { %v1658_v52 = vpop.f32.mrb[2].mxu0 }
  0xe6   :  { %v245_v53 = vpop.f32.mrb[3].mxu0 }
  0xe9   :  { %v1661_v54 = vpop.f32.mrb[4].mxu0 }
  0xea   :  { %v255_v55 = vpop.f32.mrb[5].mxu0 }
  0xed   :  { %v1664_v56 = vpop.f32.mrb[6].mxu0 }
  0xee   :  { %v265_v57 = vpop.f32.mrb[7].mxu0 }
  0xf1   :  { %v1667_v58 = vpop.f32.mrb[8].mxu0 }
  0xf2   :  { %v414_v59 = vmax.f32 %v235_v50, %v1667_v58  ;;  %v275_v60 = vpop.f32.mrb[9].mxu0  ;;  %v615_v58 = vld [vmem:[%s2297_s2 + $0x50] sm:$0xff] }
  0xf5   :  { %v1670_v61 = vpop.f32.mrb[10].mxu0 }
  0xf6   :  { %v416_v62 = vmax.f32 %v245_v53, %v1670_v61  ;;  %v285_v63 = vpop.f32.mrb[11].mxu0 }
  0xf7   :  { %v415_v0 = vmax.f32 %v1655_v48, %v285_v63  ;;  %v691_v63 = vld [vmem:[%s2297_s2 + $0x60] sm:$0xff] }
  0xf9   :  { %v1673_v1 = vpop.f32.mrb[12].mxu0 }
  0xfa   :  { %v418_v2 = vmax.f32 %v255_v55, %v1673_v1  ;;  %v295_v3 = vpop.f32.mrb[13].mxu0 }
  0xfb   :  { %v417_v4 = vmax.f32 %v1658_v52, %v295_v3 }
  0xfd   :  { %v1676_v5 = vpop.f32.mrb[14].mxu0 }
  0xfe   :  { %v420_v6 = vmax.f32 %v265_v57, %v1676_v5  ;;  %v305_v7 = vpop.f32.mrb[15].mxu0  ;;  %v768_v5 = vld [vmem:[%s2297_s2 + $0x78] sm:$0xff] }
  0xff   :  { %v419_v8 = vmax.f32 %v1661_v54, %v305_v7 }
 0x101   :  { %v1679_v9 = vpop.f32.mrb[16].mxu0 }
 0x102   :  { %v422_v10 = vmax.f32 %v275_v60, %v1679_v9  ;;  %v315_v11 = vpop.f32.mrb[17].mxu0  ;;  %v843_v9 = vld [vmem:[%s2297_s2 + $0x80] sm:$0xff] }
 0x103   :  { %v421_v12 = vmax.f32 %v1664_v56, %v315_v11 }
 0x105   :  { %v1682_v13 = vpop.f32.mrb[18].mxu0 }
 0x106   :  { %v424_v14 = vmax.f32 %v415_v0, %v1682_v13  ;;  %v325_v15 = vpop.f32.mrb[19].mxu0  ;;  %v692_v0 = vld [vmem:[%s2297_s2 + $0x68] sm:$0xff] }
 0x107   :  { %v423_v16 = vmax.f32 %v414_v59, %v325_v15  ;;  %v616_v59 = vld [vmem:[%s2297_s2 + $0x58] sm:$0xff]  ;;  %v1824_v1 = vpack.c.bf16 %v692_v0, %v691_v63 }
 0x108   :  { %v1821_v60 = vpack.c.bf16 %v616_v59, %v615_v58  ;;  %v920_v15 = vld [vmem:[%s2297_s2 + $0x98] sm:$0xff] }
 0x109   :  { %v1685_v17 = vpop.f32.mrb[20].mxu0  ;;  %v1328_v58 = vld [vmem:[%s2297_s2 + $0x118] sm:$0xff] }
 0x10a   :  { %v426_v18 = vmax.f32 %v417_v4, %v1685_v17  ;;  %v335_v19 = vpop.f32.mrb[21].mxu0  ;;  %v767_v4 = vld [vmem:[%s2297_s2 + $0x70] sm:$0xff] }
 0x10b   :  { %v425_v20 = vmax.f32 %v416_v62, %v335_v19  ;;  %v995_v19 = vld [vmem:[%s2297_s2 + $0xa0] sm:$0xff] }
 0x10d   :  { %v1688_v21 = vpop.f32.mrb[22].mxu0 }
 0x10e   :  { %v2104_v22 = vmax.f32 %v419_v8, %v1688_v21  ;;  %v345_v23 = vpop.f32.mrb[23].mxu0 }
 0x10f   :  { %v427_v24 = vmax.f32 %v418_v2, %v345_v23 }
 0x111   :  { %v1691_v25 = vpop.f32.mrb[24].mxu0 }
 0x112   :  { %v2106_v26 = vmax.f32 %v421_v12, %v1691_v25  ;;  %v355_v27 = vpop.f32.mrb[25].mxu0  ;;  %v1072_v25 = vld [vmem:[%s2297_s2 + $0xb8] sm:$0xff] }
 0x113   :  { %v2108_v28 = vmax.f32 %v420_v6, %v355_v27  ;;  %v1827_v6 = vpack.c.bf16 %v768_v5, %v767_v4  ;;  %v1555_v4 = vld [vmem:[%s2297_s2 + $0x120] ss:$0 sm:$0xff] }
 0x114   :  { %v439_v29 = vmax.f32 %v2106_v26, %v2102_v51  ;;  %v1168_v26 = vld [vmem:[%s2297_s2 + $0xe8] sm:$0xff] }
 0x115   :  { %v1694_v30 = vpop.f32.mrb[26].mxu0 }
 0x116   :  { %v432_v31 = vmax.f32 %v423_v16, %v1694_v30  ;;  %v365_v32 = vpop.f32.mrb[27].mxu0  ;;  %v453_v23 = vadd.f32 %v2115_v36, %v439_v29  ;;  %v1169_v29 = vld [vmem:[%s2297_s2 + $0xf0] sm:$0xff] }
 0x117   :  { %v431_v33 = vmax.f32 %v422_v10, %v365_v32  ;;  %v844_v10 = vld [vmem:[%s2297_s2 + $0x88] sm:$0xff]  ;;  %v1842_v30 = vpack.c.bf16 %v1169_v29, %v1168_v26  ;;  %v1165_v32 = vld [vmem:[%s2297_s2 + $0xd0] sm:$0xff] }
 0x118   :  { %v446_v56 = vadd.f32 %v2115_v36, %v432_v31  ;;  %v1830_v11 = vpack.c.bf16 %v844_v10, %v843_v9  ;;  %v1164_v31 = vld [vmem:[%s2297_s2 + $0xc8] sm:$0xff] }
 0x119   :  { %v440_v34 = vmax.f32 %v431_v33, %v1706_v49  ;;  %v1697_v35 = vpop.f32.mrb[28].mxu0  ;;  %v1818_v49 = vpack.c.bf16 %v465_v42, %v464_v41  ;;  %v1171_v33 = vld [vmem:[%s2296_s1] sm:$0x3] }
 0x11a   :  { %v434_v37 = vmax.f32 %v425_v20, %v1697_v35  ;;  %v375_v38 = vpop.f32.mrb[29].mxu0  ;;  %v455_v61 = vmax.f32 %v446_v56, 0.0  ;;  %v996_v20 = vld [vmem:[%s2297_s2 + $0xa8] sm:$0xff]  ;;  %v1166_v35 = vld [vmem:[%s2297_s2 + $0xd8] sm:$0xff] }
 0x11b   :  { %v2118_v39 = vadd.f32 %v2115_v36, %v440_v34  ;;  %v433_v40 = vmax.f32 %v424_v14, %v375_v38  ;;  %v919_v14 = vld [vmem:[%s2297_s2 + $0x90] sm:$0xff]  ;;  %v1836_v21 = vpack.c.bf16 %v996_v20, %v995_v19  ;;  %v1845_v34 = vpack.c.bf16 %v1165_v32, %v1164_v31 }
 0x11c   :  { %v448_v62 = vadd.f32 %v2115_v36, %v434_v37  ;;  %v1833_v16 = vpack.c.bf16 %v920_v15, %v919_v14 }
 0x11d   :  { %v447_v43 = vadd.f32 %v2115_v36, %v433_v40  ;;  %v1700_v44 = vpop.f32.mrb[30].mxu0  ;;  %v463_v51 = vmax.f32 %v2118_v39, 0.0 }
 0x11e   :  { %v436_v45 = vmax.f32 %v427_v24, %v1700_v44  ;;  %v385_v48 = vpop.f32.mrb[31].mxu0  ;;  %v457_v2 = vmax.f32 %v448_v62, 0.0  ;;  %v1071_v24 = vld [vmem:[%s2297_s2 + $0xb0] sm:$0xff] }
 0x11f   :  { %v456_v50 = vmax.f32 %v447_v43, 0.0  ;;  %v435_v52 = vmax.f32 %v426_v18, %v385_v48  ;;  %v1839_v27 = vpack.c.bf16 %v1072_v25, %v1071_v24 }
 0x120   :  { %v450_v8 = vadd.f32 %v2115_v36, %v436_v45  ;;  %v1551_v45 = vld [vmem:[%s2297_s2 + $0xc0] ss:$0 sm:$0xff] }
 0x121   :  { %v1703_v53 = vpop.f32.mrb[32].mxu0  ;;  %1712 = vmatmul.mubr.msk.f32.vlgmr.msra.gmra.mrb[2].mxu1 %vm468_vm3, %v456_v50  ;;  %v449_v3 = vadd.f32 %v2115_v36, %v435_v52 }
 0x122   :  { %v438_v54 = vmax.f32 %v2108_v28, %v1703_v53  ;;  %1819 = vmatpush3.bf16.msra.mxu1 %v1818_v49  ;;  %v395_v55 = vpop.f32.mrb[33].mxu0  ;;  %1718 = vmatprep.mubr.msk.f32.mxu1 %vm1910_vm2, %v1911_v47  ;;  %v459_v12 = vmax.f32 %v450_v8, 0.0  ;;  %v462_v28 = vmax.f32 %v453_v23, 0.0 }
 0x123   :  { %v437_v57 = vmax.f32 %v2104_v22, %v395_v55  ;;  %1820 = vmatprep.subr.bf16.mxu1 %v1909_v46  ;;  %v458_v7 = vmax.f32 %v449_v3, 0.0  ;;  %v1326_v55 = vld [vmem:[%s2297_s2 + $0x108] sm:$0xff] }
 0x124   :  { %v452_v18 = vadd.f32 %v2115_v36, %v438_v54  ;;  %v1325_v54 = vld [vmem:[%s2297_s2 + $0x100] sm:$0xff] }
 0x125   :  { %v451_v13 = vadd.f32 %v2115_v36, %v437_v57  ;;  %v1167_v36 = vld [vmem:[%s2297_s2 + $0xe0] sm:$0xff]  ;;  %v1851_v56 = vpack.c.bf16 %v1326_v55, %v1325_v54  ;;  %v1327_v57 = vld [vmem:[%s2297_s2 + $0x110] sm:$0xff] }
 0x126   :  { %v461_v22 = vmax.f32 %v452_v18, 0.0  ;;  %v1848_v37 = vpack.c.bf16 %v1167_v36, %v1166_v35  ;;  %v1854_v59 = vpack.c.bf16 %v1328_v58, %v1327_v57 }
 0x127   :  { %v460_v17 = vmax.f32 %v451_v13, 0.0 }
 0x129   :  { %1719 = vmatmul.mubr.msk.f32.vlgmr.msra.gmra.mrb[2].mxu1 %vm468_vm3, %v455_v61 }
 0x12a   :  { %1822 = vmatpush3.bf16.msra.mxu1 %v1821_v60  ;;  %1725 = vmatprep.mubr.msk.f32.mxu1 %vm1910_vm2, %v1911_v47  ;;  %v1554_v60 = vld [vmem:[%s2297_s2 + $0xf8] ss:$0 sm:$0xff] }
 0x12b   :  { %1823 = vmatprep.subr.bf16.mxu1 %v1909_v46 }
 0x131   :  { %1726 = vmatmul.mubr.msk.f32.vlgmr.msra.gmra.mrb[2].mxu1 %vm468_vm3, %v457_v2  ;;  %v1408_v2 = vld [vmem:[%s2297_s2 + $0x128] sm:$0xff] }
 0x132   :  { %1825 = vmatpush3.bf16.msra.mxu1 %v1824_v1  ;;  %1732 = vmatprep.mubr.msk.f32.mxu1 %vm1910_vm2, %v1911_v47 }
 0x133   :  { %1826 = vmatprep.subr.bf16.mxu1 %v1909_v46 }
 0x139   :  { %1733 = vmatmul.mubr.msk.f32.vlgmr.msra.gmra.mrb[2].mxu1 %vm468_vm3, %v458_v7 }
 0x13a   :  { %1828 = vmatpush3.bf16.msra.mxu1 %v1827_v6  ;;  %1739 = vmatprep.mubr.msk.f32.mxu1 %vm1910_vm2, %v1911_v47 }
 0x13b   :  { %1829 = vmatprep.subr.bf16.mxu1 %v1909_v46 }
 0x141   :  { %1740 = vmatmul.mubr.msk.f32.vlgmr.msra.gmra.mrb[2].mxu1 %vm468_vm3, %v459_v12 }
 0x142   :  { %1831 = vmatpush3.bf16.msra.mxu1 %v1830_v11  ;;  %1746 = vmatprep.mubr.msk.f32.mxu1 %vm1910_vm2, %v1911_v47 }
 0x143   :  { %1832 = vmatprep.subr.bf16.mxu1 %v1909_v46 }
 0x149   :  { %1747 = vmatmul.mubr.msk.f32.vlgmr.msra.gmra.mrb[2].mxu1 %vm468_vm3, %v460_v17 }
 0x14a   :  { %1834 = vmatpush3.bf16.msra.mxu1 %v1833_v16  ;;  %1753 = vmatprep.mubr.msk.f32.mxu1 %vm1910_vm2, %v1911_v47 }
 0x14b   :  { %1835 = vmatprep.subr.bf16.mxu1 %v1909_v46 }
 0x151   :  { %1754 = vmatmul.mubr.msk.f32.vlgmr.msra.gmra.mrb[2].mxu1 %vm468_vm3, %v461_v22 }
 0x152   :  { %1837 = vmatpush3.bf16.msra.mxu1 %v1836_v21  ;;  %1760 = vmatprep.mubr.msk.f32.mxu1 %vm1910_vm2, %v1911_v47 }
 0x153   :  { %1838 = vmatprep.subr.bf16.mxu1 %v1909_v46 }
 0x159   :  { %1761 = vmatmul.mubr.msk.f32.vlgmr.msra.gmra.mrb[2].mxu1 %vm468_vm3, %v462_v28 }
 0x15a   :  { %1840 = vmatpush3.bf16.msra.mxu1 %v1839_v27  ;;  %1767 = vmatprep.mubr.msk.f32.mxu1 %vm1910_vm2, %v1911_v47 }
 0x15b   :  { %1841 = vmatprep.subr.bf16.mxu1 %v1909_v46 }
 0x161   :  { %1768 = vmatmul.mubr.msk.f32.vlgmr.msra.gmra.mrb[2].mxu1 %vm468_vm3, %v463_v51 }
 0x162   :  { %1774 = vmatprep.mubr.msk.f32.mxu1 %vm1910_vm2, %v1911_v47  ;;  %1843 = vmatpush3.bf16.msra.mxu1 %v1842_v30 }
 0x163   :  { %1844 = vmatprep.subr.bf16.mxu1 %v1909_v46 }
 0x165   :  { %1775 = vmatmul.mubr.msk.f32.vlgmr.msra.gmra.mrb[4].mxu1 %vm468_vm3, %v1171_v33 }
 0x166   :  { %1846 = vmatpush3.bf16.msra.mxu1 %v1845_v34  ;;  %1785 = vmatprep.mubr.msk.f32.mxu1 %vm1910_vm2, %v1911_v47 }
 0x167   :  { %1847 = vmatprep.subr.bf16.mxu1 %v1909_v46 }
 0x16a   :  { %1849 = vmatpush3.bf16.msra.mxu1 %v1848_v37 }
 0x16b   :  { %1850 = vmatprep.subr.bf16.mxu1 %v1909_v46 }
 0x234   :  { %v1142_v38 = vpop.f32.mrb[2].mxu1 }
 0x235   :  { %v1148_v39 = vrot.slane %v1142_v38, 2  ;;  %v1769_v40 = vpop.f32.mrb[3].mxu1  ;;  %v1151_v42 = vrot.slane %v1142_v38, 4  ;;  %v1154_v44 = vrot.slane %v1142_v38, 6 }
 0x237   :  { %v1150_v41 = vmax.f32 %v1142_v38, %v1148_v39 }
 0x238   :  { %v1241_v52 = vpop.f32.mrb[4].mxu1 }
 0x239   :  { %v1153_v43 = vmax.f32 %v1150_v41, %v1151_v42  ;;  %v1776_v53 = vpop.f32.mrb[5].mxu1 }
 0x23b   :  { %v1156_v48 = vmax.f32 %v1153_v43, %v1154_v44 }
 0x23d   :  { %v1162_v49 = vadd.f32 %v1551_v45, %v1156_v48 }
 0x23f   :  { %v1163_v50 = vmax.f32 %v1162_v49, 0.0 }
 0x241   :  { %1786 = vmatmul.mubr.msk.f32.vlgmr.msra.gmra.mrb[6].mxu1 %vm1245_vm4, %v1163_v50 }
 0x242   :  { %1796 = vmatprep.mubr.msk.f32.mxu1 %vm1910_vm2, %v1911_v47  ;;  %1852 = vmatpush3.bf16.msra.mxu1 %v1851_v56 }
 0x243   :  { %1853 = vmatprep.subr.bf16.mxu1 %v1909_v46 }
 0x246   :  { %1855 = vmatpush3.bf16.msra.mxu1 %v1854_v59 }
 0x247   :  { %1856 = vmatprep.subr.bf16.mxu1 %v1909_v46  ;;  %v1409_v46 = vld [vmem:[%s2297_s2 + $0x130] sm:$0xff] }
 0x248   :  { %v1857_v3 = vpack.c.bf16 %v1409_v46, %v1408_v2 }
 0x314   :  { %v1315_v61 = vpop.f32.mrb[6].mxu1 }
 0x315   :  { %v1316_v62 = vadd.f32 %v1315_v61, %v1241_v52  ;;  %v1787_v63 = vpop.f32.mrb[7].mxu1 }
 0x317   :  { %v1323_v0 = vadd.f32 %v1554_v60, %v1316_v62 }
 0x319   :  { %v1324_v1 = vmax.f32 %v1323_v0, 0.0 }
 0x31b   :  { %1797 = vmatmul.mubr.msk.f32.vlgmr.msra.gmra.mrb[8].mxu1 %vm1245_vm4, %v1324_v1 }
 0x31c   :  { %1803 = vmatprep.mubr.msk.f32.mxu1 %vm1910_vm2, %v1911_v47  ;;  %1858 = vmatpush3.bf16.msra.mxu1 %v1857_v3  ;;  %v1557_v47 = vld [vmem:[%s2297_s2 + $0x138] ss:$0 sm:$0xff] }
 0x3ee   :  { %v1403_v5 = vpop.f32.mrb[8].mxu1 }
 0x3ef   :  { %v1404_v6 = vadd.f32 %v1555_v4, %v1403_v5  ;;  %v1798_v7 = vpop.f32.mrb[9].mxu1 }
 0x3f1   :  { %v1407_v8 = vmax.f32 %v1404_v6, 0.0 }
 0x3f3   :  { %1804 = vmatmul.mubr.msk.f32.vlgmr.msra.gmra.mrb[10].mxu1 %vm468_vm3, %v1407_v8 }
 0x4c6   :  { %v1484_v9 = vpop.f32.mrb[10].mxu1 }
 0x4c7   :  { %v1485_v10 = vadd.f32 %v1557_v47, %v1484_v9  ;;  %v1805_v11 = vpop.f32.mrb[11].mxu1 }
 0x4c9   :  { %1489 = vst.msk [vmem:[#allocation2] sm:$0x3] %vm1488_vm5, %v1485_v10 }
 0x4ca   :  { %1896 = shalt.err (!%p1893_p4)
}
 0x4cb   :  { %s1897_s5 = scalar_lea.hbm %s2298_s3, 32 }
 0x4cc   :  { %p1898_p5 = scmp.ne.s32.totalorder %s2298_s3, %s1897_s5  ;;  %p1901_p6 = scmp.lt.u32.totalorder %s1897_s5, %s2298_s3 }
 0x4ce   :  { %p1903_p7 = pnand %p1901_p6, %p1898_p5 }
 0x4d0   :  { %1906 = shalt.err (!%p1903_p7)
}
 0x4d1   :  { %1499 = dma.vmem_to_hbm [thread:$0]  %s1497_s28, 32, %s2298_s3, [#allocation3]  }
 0x4d2   :  { %1907 = dma.done.wait [#allocation3], 32  }
 0x4d3   :  { %1908 = vsyncadd [#allocation3], 4294967264 }
 0x4d4   :  { %1503 = vsyncpa [#allocation3], 1 }

</bundles_post_ra>
